<compile_context>
chip_gen: v7x
topology: tpu7x:2x2x1
jax: 0.10.0
libtpu: 0.0.40
codegen_flags: <defaults>
</compile_context>

<pallas_src>
import jax
import jax.numpy as jnp
from jax import lax
from jax.experimental import pallas as pl
from jax.experimental.pallas import tpu as pltpu


def _vmem_capacity_bytes(default_bytes=64 << 20):
    """Physical VMEM of the local TPU generation (64 MiB/TC v7x, 128 MiB v5e/v6e)."""
    try:
        info = pltpu.get_tpu_info()
        cap = getattr(info, "vmem_capacity_bytes", None)
        if cap:
            return int(cap)
    except Exception:
        pass
    return default_bytes


def _largest_divisor_leq(n, cap):
    cap = max(1, min(int(cap), n))
    best = 1
    for d in range(1, cap + 1):
        if n % d == 0:
            best = d
    return best


def _make_continuity_kernel(ty, z, y_total, has_z, needs_mask):
    """Build the per-(batch, Y-chunk, HW-chunk) kernel.

    x_ref  : VMEM (ty, Z, hw_tile)  main Y-chunk (batch squeezed)
    xb_ref : VMEM (Z, hw_tile)      slab just *before* this chunk; for the first
                                    chunk it is the chunk's own first slab, so
                                    the boundary diff is exactly 0 there.
    out_ref: VMEM (2, 128)          lane-replicated partials [sum|dY|, sum|dZ|]
    """

    def kernel(x_ref, xb_ref, out_ref):
        yc = pl.program_id(1)

        # ---- slab 0: Y-boundary diff + its Z-diffs (always valid) ----
        slab0 = x_ref[0]
        acc_y = jnp.abs(slab0 - xb_ref[...]).astype(jnp.float32)
        if has_z:
            acc_z = jnp.abs(
                x_ref[0, pl.ds(1, z - 1), :]
                - x_ref[0, pl.ds(0, z - 1), :]).astype(jnp.float32)

        if needs_mask:
            valid = jnp.minimum(ty, y_total - yc * ty)  # slabs in this chunk

        # ---- interior slabs: pure vld/VALU loop, no XLU on the carry ----
        def body(y, carry):
            d_y = jnp.abs(x_ref[y] - x_ref[y - 1]).astype(jnp.float32)
            if has_z:
                a_y, a_z = carry
                d_z = jnp.abs(
                    x_ref[y, pl.ds(1, z - 1), :]
                    - x_ref[y, pl.ds(0, z - 1), :]).astype(jnp.float32)
            else:
                (a_y,) = carry
            if needs_mask:
                live = y < valid
                d_y = jnp.where(live, d_y, 0.0)
                if has_z:
                    d_z = jnp.where(live, d_z, 0.0)
            if has_z:
                return (a_y + d_y, a_z + d_z)
            return (a_y + d_y,)

        carry = (acc_y, acc_z) if has_z else (acc_y,)
        if ty > 1:
            # Partial numeric unroll so the LLO scheduler can pack vld/VALU
            # slots across slabs without blowing up code size.
            carry = lax.fori_loop(1, ty, body, carry, unroll=min(ty - 1, 8))

        # ---- one cross-lane reduction per accumulator, after the loop ----
        sum_y = jnp.sum(carry[0])
        sum_z = jnp.sum(carry[1]) if has_z else jnp.float32(0.0)

        # Two direct lane-dense row stores (no concatenate / relayout).
        out_ref[0:1, :] = jnp.full((1, 128), sum_y, dtype=jnp.float32)
        out_ref[1:2, :] = jnp.full((1, 128), sum_z, dtype=jnp.float32)

    return kernel


def continuity_loss(predictions, *, y_block=None, hw_block=None,
                    target_block_bytes=None):
    """Pallas TPU implementation of ContinuityLoss.forward.

    Note: Y == 1 or Z == 1 reproduces PyTorch's mean-over-empty => NaN.
    """
    B, Y, Z, H, W = predictions.shape
    HW = H * W
    itemsize = jnp.dtype(predictions.dtype).itemsize

    # Lane-dense layout: fold H, W into the trailing axis (never differenced).
    x = predictions.reshape(B, Y, Z, HW)

    # ---- generation-aware streaming-block target & VMEM budget ----
    vmem_cap = _vmem_capacity_bytes()
    if target_block_bytes is None:
        # ~8-16 MiB blocks (85%+ of HBM roofline on all generations) while
        # leaving room for the double-buffered main block, boundary slabs and
        # headroom under the physical VMEM of this generation.
        target_block_bytes = int(
            min(16 << 20, max(2 << 20, (vmem_cap - (16 << 20)) // 4)))

    # ---- HW (lane) tiling: only when a full (Z, HW) slab is too large ----
    if hw_block is not None:
        hw_tile = int(hw_block)
        if hw_tile != HW and (HW % hw_tile != 0 or hw_tile % 128 != 0):
            raise ValueError("hw_block must divide H*W and be a multiple of 128")
    elif HW % 128 != 0 or Z * HW * itemsize * min(Y, 4) <= target_block_bytes:
        hw_tile = HW
    else:
        m = HW // 128
        slab_budget = max(target_block_bytes // min(Y, 8), Z * 128 * itemsize)
        hw_tile = 128
        for d in range(1, m + 1):
            if m % d == 0:
                cand = 128 * d
                if Z * cand * itemsize <= slab_budget and cand > hw_tile:
                    hw_tile = cand
    nhc = HW // hw_tile
    slab_bytes = Z * hw_tile * itemsize

    # ---- Y chunking: prefer a divisor near the target, else ragged + mask ----
    ty_target = max(1, min(Y, target_block_bytes // max(slab_bytes, 1)))
    if y_block is not None:
        ty = int(y_block)
        if not 1 <= ty <= Y:
            raise ValueError("y_block must be in [1, Y]")
    else:
        ty = _largest_divisor_leq(Y, ty_target)
        if ty < max(1, ty_target // 2):
            # Awkward Y (e.g. prime): keep the big block, mask the ragged tail.
            ty = ty_target
    nyc = pl.cdiv(Y, ty)
    needs_mask = (Y % ty) != 0

    # ---- VMEM limit: double-buffered main + boundary + accumulators ----
    block_bytes = ty * slab_bytes
    acc_bytes = 2 * Z * hw_tile * 4
    vmem_need = 2 * block_bytes + 2 * slab_bytes + acc_bytes + (4 << 20)
    vmem_limit = max(vmem_need, 32 << 20)
    vmem_limit = min(vmem_limit, max(vmem_cap - (2 << 20), vmem_need))
    vmem_limit = int(min(vmem_limit, vmem_cap))

    total = B * Y * Z * HW
    cost = pl.CostEstimate(
        flops=6 * total,
        transcendentals=0,
        bytes_accessed=(total * itemsize                 # streamed input
                        + B * nyc * nhc * slab_bytes     # boundary-slab re-read
                        + B * nyc * nhc * 2 * 128 * 4),  # partial sums out
    )

    kernel = _make_continuity_kernel(ty, Z, Y, Z > 1, needs_mask)

    def main_map(b, yc, hc):
        return (b, yc, 0, hc)

    def boundary_map(b, yc, hc):
        # Slab just before this chunk; clamped to slab 0 for the first chunk
        # (there the boundary diff is |x0 - x0| == 0 by construction).
        return (b, jnp.maximum(yc * ty - 1, 0), 0, hc)

    partials = pl.pallas_call(
        kernel,
        out_shape=jax.ShapeDtypeStruct((B, nyc, nhc, 2, 128), jnp.float32),
        grid=(B, nyc, nhc),
        in_specs=[
            pl.BlockSpec((None, ty, Z, hw_tile), main_map),
            pl.BlockSpec((None, None, Z, hw_tile), boundary_map),
        ],
        out_specs=pl.BlockSpec((None, None, None, 2, 128),
                               lambda b, yc, hc: (b, yc, hc, 0, 0)),
        compiler_params=pltpu.CompilerParams(
            # No carried state: every grid axis is independent, so all three
            # are shardable across TensorCores (v7x megacore, even for B == 1).
            dimension_semantics=("parallel", "parallel", "parallel"),
            vmem_limit_bytes=vmem_limit,
        ),
        cost_estimate=cost,
    )(x, x)

    # Per-block partials -> final means in the wrapper.
    sum_y = jnp.sum(partials[:, :, :, 0, 0])
    sum_z = jnp.sum(partials[:, :, :, 1, 0])

    n_y = B * (Y - 1) * Z * H * W   # element count of hp_y (0 -> NaN, as torch)
    n_z = B * Y * (Z - 1) * H * W   # element count of hp_z
    return sum_y / jnp.float32(n_y) + sum_z / jnp.float32(n_z)


def _reference(predictions):
    x = predictions.astype(jnp.float32)
    hp_y = x[:, 1:, :, :, :] - x[:, :-1, :, :, :]
    hp_z = x[:, :, 1:, :, :] - x[:, :, :-1, :, :]
    return jnp.mean(jnp.abs(hp_y)) + jnp.mean(jnp.abs(hp_z))


if __name__ == "__main__":
    # Small 5-D input consistent with the module: [B, Y, Z, H, W]
    key = jax.random.PRNGKey(0)
    x = jax.random.normal(key, (2, 6, 4, 8, 32), dtype=jnp.float32)

    ref = jax.block_until_ready(_reference(x))

    # Default tiling (single Y-chunk / full HW at this size).
    loss = jax.block_until_ready(continuity_loss(x))
    assert jnp.allclose(loss, ref, rtol=1e-5, atol=1e-5), (loss, ref)

    # Multiple Y-chunks: exercises the boundary-slab overlap read.
    loss_c = jax.block_until_ready(continuity_loss(x, y_block=2))
    assert jnp.allclose(loss_c, ref, rtol=1e-5, atol=1e-5), (loss_c, ref)

    # Ragged last Y-chunk (cdiv grid + validity masking).
    loss_r = jax.block_until_ready(continuity_loss(x, y_block=4))
    assert jnp.allclose(loss_r, ref, rtol=1e-5, atol=1e-5), (loss_r, ref)

    # HW (lane-axis) tiling path combined with multiple Y-chunks.
    loss_hw = jax.block_until_ready(continuity_loss(x, y_block=3, hw_block=128))
    assert jnp.allclose(loss_hw, ref, rtol=1e-5, atol=1e-5), (loss_hw, ref)

    print("KERNEL_OK")
</pallas_src>

<mosaic_0001>
module attributes {stable_mosaic.version = 11 : i64} {
  func.func @kernel(%arg0: i32, %arg1: i32, %arg2: i32, %arg3: memref<1x6x4x256xf32, #tpu.memory_space<vmem>>, %arg4: memref<1x1x4x256xf32, #tpu.memory_space<vmem>>, %arg5: memref<1x1x1x2x128xf32, #tpu.memory_space<vmem>>) attributes {dimension_semantics = [#tpu.dimension_semantics<parallel>, #tpu.dimension_semantics<parallel>, #tpu.dimension_semantics<parallel>], iteration_bounds = array<i64: 2, 1, 1>, scalar_prefetch = 0 : i64, scratch_operands = 0 : i64, tpu.core_type = #tpu.core_type<tc>, window_params = [{transform_indices = @transform_0, window_bounds = array<i64: 1, 6, 4, 256>}, {transform_indices = @transform_1, window_bounds = array<i64: 1, 1, 4, 256>}, {transform_indices = @transform_2, window_bounds = array<i64: 1, 1, 1, 2, 128>}]} {
    %c0 = arith.constant 0 : index
    %c0_0 = arith.constant 0 : index
    %c0_1 = arith.constant 0 : index
    %c0_2 = arith.constant 0 : index
    %0 = vector.load %arg3[%c0, %c0_0, %c0_1, %c0_2] : memref<1x6x4x256xf32, #tpu.memory_space<vmem>>, vector<1x1x4x256xf32>
    %1 = vector.shape_cast %0 : vector<1x1x4x256xf32> to vector<4x256xf32>
    %c0_3 = arith.constant 0 : index
    %c0_4 = arith.constant 0 : index
    %c0_5 = arith.constant 0 : index
    %c0_6 = arith.constant 0 : index
    %2 = vector.load %arg4[%c0_3, %c0_4, %c0_5, %c0_6] : memref<1x1x4x256xf32, #tpu.memory_space<vmem>>, vector<1x1x4x256xf32>
    %3 = vector.shape_cast %2 : vector<1x1x4x256xf32> to vector<4x256xf32>
    %4 = arith.subf %1, %3 : vector<4x256xf32>
    %5 = math.absf %4 : vector<4x256xf32>
    %c0_7 = arith.constant 0 : index
    %c0_8 = arith.constant 0 : index
    %c1 = arith.constant 1 : index
    %c0_9 = arith.constant 0 : index
    %6 = vector.load %arg3[%c0_7, %c0_8, %c1, %c0_9] : memref<1x6x4x256xf32, #tpu.memory_space<vmem>>, vector<1x1x3x256xf32>
    %7 = vector.shape_cast %6 : vector<1x1x3x256xf32> to vector<3x256xf32>
    %c0_10 = arith.constant 0 : index
    %c0_11 = arith.constant 0 : index
    %c0_12 = arith.constant 0 : index
    %c0_13 = arith.constant 0 : index
    %8 = vector.load %arg3[%c0_10, %c0_11, %c0_12, %c0_13] : memref<1x6x4x256xf32, #tpu.memory_space<vmem>>, vector<1x1x3x256xf32>
    %9 = vector.shape_cast %8 : vector<1x1x3x256xf32> to vector<3x256xf32>
    %10 = arith.subf %7, %9 : vector<3x256xf32>
    %11 = math.absf %10 : vector<3x256xf32>
    %c1_i32 = arith.constant 1 : i32
    %c0_14 = arith.constant 0 : index
    %12 = arith.index_cast %c1_i32 : i32 to index
    %c0_15 = arith.constant 0 : index
    %c0_16 = arith.constant 0 : index
    %13 = vector.load %arg3[%c0_14, %12, %c0_15, %c0_16] : memref<1x6x4x256xf32, #tpu.memory_space<vmem>>, vector<1x1x4x256xf32>
    %14 = vector.shape_cast %13 : vector<1x1x4x256xf32> to vector<4x256xf32>
    %c1_i32_17 = arith.constant 1 : i32
    %15 = arith.subi %c1_i32, %c1_i32_17 : i32
    %c0_18 = arith.constant 0 : index
    %16 = arith.index_cast %15 : i32 to index
    %c0_19 = arith.constant 0 : index
    %c0_20 = arith.constant 0 : index
    %17 = vector.load %arg3[%c0_18, %16, %c0_19, %c0_20] : memref<1x6x4x256xf32, #tpu.memory_space<vmem>>, vector<1x1x4x256xf32>
    %18 = vector.shape_cast %17 : vector<1x1x4x256xf32> to vector<4x256xf32>
    %19 = arith.subf %14, %18 : vector<4x256xf32>
    %20 = math.absf %19 : vector<4x256xf32>
    %c0_21 = arith.constant 0 : index
    %21 = arith.index_cast %c1_i32 : i32 to index
    %c1_22 = arith.constant 1 : index
    %c0_23 = arith.constant 0 : index
    %22 = vector.load %arg3[%c0_21, %21, %c1_22, %c0_23] : memref<1x6x4x256xf32, #tpu.memory_space<vmem>>, vector<1x1x3x256xf32>
    %23 = vector.shape_cast %22 : vector<1x1x3x256xf32> to vector<3x256xf32>
    %c0_24 = arith.constant 0 : index
    %24 = arith.index_cast %c1_i32 : i32 to index
    %c0_25 = arith.constant 0 : index
    %c0_26 = arith.constant 0 : index
    %25 = vector.load %arg3[%c0_24, %24, %c0_25, %c0_26] : memref<1x6x4x256xf32, #tpu.memory_space<vmem>>, vector<1x1x3x256xf32>
    %26 = vector.shape_cast %25 : vector<1x1x3x256xf32> to vector<3x256xf32>
    %27 = arith.subf %23, %26 : vector<3x256xf32>
    %28 = math.absf %27 : vector<3x256xf32>
    %29 = arith.addf %5, %20 : vector<4x256xf32>
    %30 = arith.addf %11, %28 : vector<3x256xf32>
    %c2_i32 = arith.constant 2 : i32
    %c0_27 = arith.constant 0 : index
    %31 = arith.index_cast %c2_i32 : i32 to index
    %c0_28 = arith.constant 0 : index
    %c0_29 = arith.constant 0 : index
    %32 = vector.load %arg3[%c0_27, %31, %c0_28, %c0_29] : memref<1x6x4x256xf32, #tpu.memory_space<vmem>>, vector<1x1x4x256xf32>
    %33 = vector.shape_cast %32 : vector<1x1x4x256xf32> to vector<4x256xf32>
    %c1_i32_30 = arith.constant 1 : i32
    %34 = arith.subi %c2_i32, %c1_i32_30 : i32
    %c0_31 = arith.constant 0 : index
    %35 = arith.index_cast %34 : i32 to index
    %c0_32 = arith.constant 0 : index
    %c0_33 = arith.constant 0 : index
    %36 = vector.load %arg3[%c0_31, %35, %c0_32, %c0_33] : memref<1x6x4x256xf32, #tpu.memory_space<vmem>>, vector<1x1x4x256xf32>
    %37 = vector.shape_cast %36 : vector<1x1x4x256xf32> to vector<4x256xf32>
    %38 = arith.subf %33, %37 : vector<4x256xf32>
    %39 = math.absf %38 : vector<4x256xf32>
    %c0_34 = arith.constant 0 : index
    %40 = arith.index_cast %c2_i32 : i32 to index
    %c1_35 = arith.constant 1 : index
    %c0_36 = arith.constant 0 : index
    %41 = vector.load %arg3[%c0_34, %40, %c1_35, %c0_36] : memref<1x6x4x256xf32, #tpu.memory_space<vmem>>, vector<1x1x3x256xf32>
    %42 = vector.shape_cast %41 : vector<1x1x3x256xf32> to vector<3x256xf32>
    %c0_37 = arith.constant 0 : index
    %43 = arith.index_cast %c2_i32 : i32 to index
    %c0_38 = arith.constant 0 : index
    %c0_39 = arith.constant 0 : index
    %44 = vector.load %arg3[%c0_37, %43, %c0_38, %c0_39] : memref<1x6x4x256xf32, #tpu.memory_space<vmem>>, vector<1x1x3x256xf32>
    %45 = vector.shape_cast %44 : vector<1x1x3x256xf32> to vector<3x256xf32>
    %46 = arith.subf %42, %45 : vector<3x256xf32>
    %47 = math.absf %46 : vector<3x256xf32>
    %48 = arith.addf %29, %39 : vector<4x256xf32>
    %49 = arith.addf %30, %47 : vector<3x256xf32>
    %c3_i32 = arith.constant 3 : i32
    %c0_40 = arith.constant 0 : index
    %50 = arith.index_cast %c3_i32 : i32 to index
    %c0_41 = arith.constant 0 : index
    %c0_42 = arith.constant 0 : index
    %51 = vector.load %arg3[%c0_40, %50, %c0_41, %c0_42] : memref<1x6x4x256xf32, #tpu.memory_space<vmem>>, vector<1x1x4x256xf32>
    %52 = vector.shape_cast %51 : vector<1x1x4x256xf32> to vector<4x256xf32>
    %c1_i32_43 = arith.constant 1 : i32
    %53 = arith.subi %c3_i32, %c1_i32_43 : i32
    %c0_44 = arith.constant 0 : index
    %54 = arith.index_cast %53 : i32 to index
    %c0_45 = arith.constant 0 : index
    %c0_46 = arith.constant 0 : index
    %55 = vector.load %arg3[%c0_44, %54, %c0_45, %c0_46] : memref<1x6x4x256xf32, #tpu.memory_space<vmem>>, vector<1x1x4x256xf32>
    %56 = vector.shape_cast %55 : vector<1x1x4x256xf32> to vector<4x256xf32>
    %57 = arith.subf %52, %56 : vector<4x256xf32>
    %58 = math.absf %57 : vector<4x256xf32>
    %c0_47 = arith.constant 0 : index
    %59 = arith.index_cast %c3_i32 : i32 to index
    %c1_48 = arith.constant 1 : index
    %c0_49 = arith.constant 0 : index
    %60 = vector.load %arg3[%c0_47, %59, %c1_48, %c0_49] : memref<1x6x4x256xf32, #tpu.memory_space<vmem>>, vector<1x1x3x256xf32>
    %61 = vector.shape_cast %60 : vector<1x1x3x256xf32> to vector<3x256xf32>
    %c0_50 = arith.constant 0 : index
    %62 = arith.index_cast %c3_i32 : i32 to index
    %c0_51 = arith.constant 0 : index
    %c0_52 = arith.constant 0 : index
    %63 = vector.load %arg3[%c0_50, %62, %c0_51, %c0_52] : memref<1x6x4x256xf32, #tpu.memory_space<vmem>>, vector<1x1x3x256xf32>
    %64 = vector.shape_cast %63 : vector<1x1x3x256xf32> to vector<3x256xf32>
    %65 = arith.subf %61, %64 : vector<3x256xf32>
    %66 = math.absf %65 : vector<3x256xf32>
    %67 = arith.addf %48, %58 : vector<4x256xf32>
    %68 = arith.addf %49, %66 : vector<3x256xf32>
    %c4_i32 = arith.constant 4 : i32
    %c0_53 = arith.constant 0 : index
    %69 = arith.index_cast %c4_i32 : i32 to index
    %c0_54 = arith.constant 0 : index
    %c0_55 = arith.constant 0 : index
    %70 = vector.load %arg3[%c0_53, %69, %c0_54, %c0_55] : memref<1x6x4x256xf32, #tpu.memory_space<vmem>>, vector<1x1x4x256xf32>
    %71 = vector.shape_cast %70 : vector<1x1x4x256xf32> to vector<4x256xf32>
    %c1_i32_56 = arith.constant 1 : i32
    %72 = arith.subi %c4_i32, %c1_i32_56 : i32
    %c0_57 = arith.constant 0 : index
    %73 = arith.index_cast %72 : i32 to index
    %c0_58 = arith.constant 0 : index
    %c0_59 = arith.constant 0 : index
    %74 = vector.load %arg3[%c0_57, %73, %c0_58, %c0_59] : memref<1x6x4x256xf32, #tpu.memory_space<vmem>>, vector<1x1x4x256xf32>
    %75 = vector.shape_cast %74 : vector<1x1x4x256xf32> to vector<4x256xf32>
    %76 = arith.subf %71, %75 : vector<4x256xf32>
    %77 = math.absf %76 : vector<4x256xf32>
    %c0_60 = arith.constant 0 : index
    %78 = arith.index_cast %c4_i32 : i32 to index
    %c1_61 = arith.constant 1 : index
    %c0_62 = arith.constant 0 : index
    %79 = vector.load %arg3[%c0_60, %78, %c1_61, %c0_62] : memref<1x6x4x256xf32, #tpu.memory_space<vmem>>, vector<1x1x3x256xf32>
    %80 = vector.shape_cast %79 : vector<1x1x3x256xf32> to vector<3x256xf32>
    %c0_63 = arith.constant 0 : index
    %81 = arith.index_cast %c4_i32 : i32 to index
    %c0_64 = arith.constant 0 : index
    %c0_65 = arith.constant 0 : index
    %82 = vector.load %arg3[%c0_63, %81, %c0_64, %c0_65] : memref<1x6x4x256xf32, #tpu.memory_space<vmem>>, vector<1x1x3x256xf32>
    %83 = vector.shape_cast %82 : vector<1x1x3x256xf32> to vector<3x256xf32>
    %84 = arith.subf %80, %83 : vector<3x256xf32>
    %85 = math.absf %84 : vector<3x256xf32>
    %86 = arith.addf %67, %77 : vector<4x256xf32>
    %87 = arith.addf %68, %85 : vector<3x256xf32>
    %c5_i32 = arith.constant 5 : i32
    %c0_66 = arith.constant 0 : index
    %88 = arith.index_cast %c5_i32 : i32 to index
    %c0_67 = arith.constant 0 : index
    %c0_68 = arith.constant 0 : index
    %89 = vector.load %arg3[%c0_66, %88, %c0_67, %c0_68] : memref<1x6x4x256xf32, #tpu.memory_space<vmem>>, vector<1x1x4x256xf32>
    %90 = vector.shape_cast %89 : vector<1x1x4x256xf32> to vector<4x256xf32>
    %c1_i32_69 = arith.constant 1 : i32
    %91 = arith.subi %c5_i32, %c1_i32_69 : i32
    %c0_70 = arith.constant 0 : index
    %92 = arith.index_cast %91 : i32 to index
    %c0_71 = arith.constant 0 : index
    %c0_72 = arith.constant 0 : index
    %93 = vector.load %arg3[%c0_70, %92, %c0_71, %c0_72] : memref<1x6x4x256xf32, #tpu.memory_space<vmem>>, vector<1x1x4x256xf32>
    %94 = vector.shape_cast %93 : vector<1x1x4x256xf32> to vector<4x256xf32>
    %95 = arith.subf %90, %94 : vector<4x256xf32>
    %96 = math.absf %95 : vector<4x256xf32>
    %c0_73 = arith.constant 0 : index
    %97 = arith.index_cast %c5_i32 : i32 to index
    %c1_74 = arith.constant 1 : index
    %c0_75 = arith.constant 0 : index
    %98 = vector.load %arg3[%c0_73, %97, %c1_74, %c0_75] : memref<1x6x4x256xf32, #tpu.memory_space<vmem>>, vector<1x1x3x256xf32>
    %99 = vector.shape_cast %98 : vector<1x1x3x256xf32> to vector<3x256xf32>
    %c0_76 = arith.constant 0 : index
    %100 = arith.index_cast %c5_i32 : i32 to index
    %c0_77 = arith.constant 0 : index
    %c0_78 = arith.constant 0 : index
    %101 = vector.load %arg3[%c0_76, %100, %c0_77, %c0_78] : memref<1x6x4x256xf32, #tpu.memory_space<vmem>>, vector<1x1x3x256xf32>
    %102 = vector.shape_cast %101 : vector<1x1x3x256xf32> to vector<3x256xf32>
    %103 = arith.subf %99, %102 : vector<3x256xf32>
    %104 = math.absf %103 : vector<3x256xf32>
    %105 = arith.addf %86, %96 : vector<4x256xf32>
    %106 = arith.addf %87, %104 : vector<3x256xf32>
    %c5_i32_79 = arith.constant 5 : i32
    %107 = vector.shape_cast %105 : vector<4x256xf32> to vector<1x4x256xf32>
    %cst = arith.constant dense<0.000000e+00> : vector<1xf32>
    %108 = vector.multi_reduction <add>, %107, %cst [1, 2] : vector<1x4x256xf32> to vector<1xf32>
    %109 = vector.shape_cast %108 : vector<1xf32> to vector<1x1x1xf32>
    %110 = vector.extract %109[0, 0, 0] : f32 from vector<1x1x1xf32>
    %111 = vector.shape_cast %106 : vector<3x256xf32> to vector<1x3x256xf32>
    %cst_80 = arith.constant dense<0.000000e+00> : vector<1xf32>
    %112 = vector.multi_reduction <add>, %111, %cst_80 [1, 2] : vector<1x3x256xf32> to vector<1xf32>
    %113 = vector.shape_cast %112 : vector<1xf32> to vector<1x1x1xf32>
    %114 = vector.extract %113[0, 0, 0] : f32 from vector<1x1x1xf32>
    %115 = vector.broadcast %110 : f32 to vector<1x128xf32>
    %c0_81 = arith.constant 0 : index
    %c0_82 = arith.constant 0 : index
    %c0_83 = arith.constant 0 : index
    %c0_84 = arith.constant 0 : index
    %c0_85 = arith.constant 0 : index
    %116 = vector.load %arg5[%c0_81, %c0_82, %c0_83, %c0_84, %c0_85] : memref<1x1x1x2x128xf32, #tpu.memory_space<vmem>>, vector<1x1x1x1x128xf32>
    %117 = vector.shape_cast %116 : vector<1x1x1x1x128xf32> to vector<1x128xf32>
    %118 = vector.shape_cast %115 : vector<1x128xf32> to vector<1x1x1x1x128xf32>
    tpu.vector_store %arg5[%c0_81, %c0_82, %c0_83, %c0_84, %c0_85], %118 {strides = array<i32>} : memref<1x1x1x2x128xf32, #tpu.memory_space<vmem>>, vector<1x1x1x1x128xf32>,
    %119 = vector.broadcast %114 : f32 to vector<1x128xf32>
    %c0_86 = arith.constant 0 : index
    %c0_87 = arith.constant 0 : index
    %c0_88 = arith.constant 0 : index
    %c1_89 = arith.constant 1 : index
    %c0_90 = arith.constant 0 : index
    %120 = vector.load %arg5[%c0_86, %c0_87, %c0_88, %c1_89, %c0_90] : memref<1x1x1x2x128xf32, #tpu.memory_space<vmem>>, vector<1x1x1x1x128xf32>
    %121 = vector.shape_cast %120 : vector<1x1x1x1x128xf32> to vector<1x128xf32>
    %122 = vector.shape_cast %119 : vector<1x128xf32> to vector<1x1x1x1x128xf32>
    tpu.vector_store %arg5[%c0_86, %c0_87, %c0_88, %c1_89, %c0_90], %122 {strides = array<i32>} : memref<1x1x1x2x128xf32, #tpu.memory_space<vmem>>, vector<1x1x1x1x128xf32>,
    return
  }
  func.func @transform_0(%arg0: i32, %arg1: i32, %arg2: i32) -> (i32, i32, i32, i32) {
    %c0_i32 = arith.constant 0 : i32
    %c0_i32_0 = arith.constant 0 : i32
    return %arg0, %arg1, %c0_i32, %arg2 : i32, i32, i32, i32
  }
  func.func @transform_1(%arg0: i32, %arg1: i32, %arg2: i32) -> (i32, i32, i32, i32) {
    %c6_i32 = arith.constant 6 : i32
    %0 = arith.muli %arg1, %c6_i32 : i32
    %c1_i32 = arith.constant 1 : i32
    %1 = arith.subi %0, %c1_i32 : i32
    %c0_i32 = arith.constant 0 : i32
    %2 = arith.maxsi %1, %c0_i32 : i32
    %c0_i32_0 = arith.constant 0 : i32
    %c0_i32_1 = arith.constant 0 : i32
    return %arg0, %2, %c0_i32_0, %arg2 : i32, i32, i32, i32
  }
  func.func @transform_2(%arg0: i32, %arg1: i32, %arg2: i32) -> (i32, i32, i32, i32, i32) {
    %c0_i32 = arith.constant 0 : i32
    %c0_i32_0 = arith.constant 0 : i32
    %c0_i32_1 = arith.constant 0 : i32
    return %arg0, %arg1, %arg2, %c0_i32, %c0_i32_0 : i32, i32, i32, i32, i32
  }
}

</mosaic_0001>

<bundles_post_ra>
// kernel: tpu_custom_call.1
= control target key start
LH: loop header
LB: loop body
LE: loop exit
PB: predicated region body
PF: predicated region fallthrough
CT: control target
= control target key end

     0   :  { %7 = vsyncpa [#allocation3], 0  ;;  %s1019_s0 = inlined_call_operand.hbm [shape: f32[2,6,4,256], index: 0, kind: input, shape index: {}]   ;;  %s1020_s1 = inlined_call_operand.hbm [shape: f32[2,6,4,256], index: 1, kind: input, shape index: {}]   ;;  %s1021_s2 = inlined_call_operand.hbm [shape: f32[2,1,1,2,128], index: 2, kind: output, shape index: {}]  }
   0x1   :  { %9 = vsyncpa [#allocation3 + $0x1], 0 }
   0x2   :  { %10 = vsyncpa [#allocation6], 0 }
   0x3   :  { %12 = vsyncpa [#allocation6 + $0x1], 0 }
   0x4   :  { %13 = vsyncpa [#allocation4], 0 }
   0x5   :  { %15 = vsyncpa [#allocation4 + $0x1], 0  ;;  %s780_s9 = smov 0   ;;  %s782_s10 = smov 0  }
   0x6   :  { %s784_s11 = smov 0   ;;  %s786_s12 = smov 0  }
   0x7   :  { %s788_s13 = smov 0   ;;  %s790_s14 = smov 0  }
   0x8 LB: > { %s506_s15 = sadd.s32 4294967295, %s758_s14   ;;  %s507_s16 = sadd.s32 4294967294, %s758_s14   ;;  %s758_s14 = sphi %s790_s14, %s21_s14   ;;  %s754_s13 = sphi %s788_s13, %s1040_s13   ;;  %s750_s12 = sphi %s786_s12, %s1039_s12   ;;  %s746_s11 = sphi %s784_s11, %s1038_s11   ;;  %s742_s10 = sphi %s782_s10, %s1037_s10   ;;  %s738_s9 = sphi %s780_s9, %s1036_s9  }
   0x9   : > { %s40_s17 = sadd.s32 1, %s754_s13  ;;  %s51_s18 = sadd.s32 1, %s746_s11 }
   0xa   : > { %p42_p0 = scmp.ge.s32.totalorder %s40_s17, 2  ;;  %p58_p1 = scmp.ne.s32.totalorder %s746_s11, %s742_s10 }
   0xb   : > { %p59_p2 = scmp.eq.s32.totalorder %s758_s14, 0  ;;  %p64_p3 = scmp.ne.s32.totalorder %s742_s10, %s738_s9 }
   0xc   : > { %s1042_s17 = smov (%p42_p0, %s40_s17), 0  ;;  %p65_p5 = scmp.eq.s32.totalorder %s506_s15, 0 }
   0xd   : > { %p821_p4 = por %p59_p2, %p58_p1  ;;  %s44_s20 = ssub.s32 %s754_s13, %s1042_s17 }
   0xe   : > { %p130_p6 = scmp.eq.s32.totalorder %s506_s15, 1  ;;  %p49_p7 = scmp.eq.s32.totalorder %s44_s20, 0 }
   0xf   : > { %p827_p8 = por %p65_p5, %p64_p3  ;;  %p136_p10 = scmp.eq.s32.totalorder %s507_s16, 1 }
  0x10   : > { %p831_p9 = por %p130_p6, %p58_p1  ;;  %p560_p13 = scmp.lt.s32.totalorder %s758_s14, 2 }
  0x11   : > { %s1025_s21 = scalar_select %p827_p8, 1, 0 }
  0x12   : > { %s1026_s22 = scalar_select %p831_p9, 1, 0 }
  0x13   : > { %s836_s23 = scalar_select %p49_p7, %s746_s11, %s51_s18  }
  0x14   : > { %p838_p11 = por %p136_p10, %p64_p3  ;;  %s845_s25 = sand.u32 1, %s746_s11  }
  0x15   : > { %s535_s26 = smul.u32 48, %s845_s25  ;;  %p851_p0 = pnand %p560_p13, %p821_p4 }
  0x16   : > { %s1027_s24 = scalar_select %p838_p11, 1, 0 }
  0x17   : > { %s536_s27 = smul.u32 768, %s754_s13  ;;  %s160_s4 = scalar_lea.vmem [#allocation2], %s535_s26 }
  0x18   : > { %s172_s5 = sshll.u32 %s160_s4, 4  ;;  %s157_s6 = scalar_lea.sflag [#allocation3], %s845_s25  ;;  %s862_s5 = int_to_ptr.vmem [resolvable:$true] %s172_s5 }
  0x19   : > { %s860_s3 = scalar_lea.hbm %s1019_s0, %s536_s27  ;;  %p614_p3 = pneg %p851_p0 }
  0x1a   : > { %s612_s7 = scalar_lea.hbm %s860_s3, 768  ;;  %s617_s16 = scalar_lea.hbm %s1019_s0, 1536 }
  0x1b   : > { %p613_p2 = scmp.ne.s32.totalorder %s860_s3, %s612_s7  ;;  %p618_p6 = scmp.lt.u32.totalorder %s860_s3, %s1019_s0 }
  0x1c   : > { %p619_p7 = scmp.lt.u32.totalorder %s617_s16, %s612_s7  ;;  %p621_p13 = scmp.lt.u32.totalorder %s612_s7, %s860_s3 }
  0x1d   : > { %p615_p4 = pnand %p614_p3, %p613_p2 }
  0x1e   : > { %p620_p10 = por %p619_p7, %p618_p6 }
  0x1f   : > { %p616_p5 = pneg %p615_p4 }
  0x20   : > { %p622_p12 = por %p621_p13, %p620_p10 }
  0x22   : > { %p623_p1 = pnand %p622_p12, %p616_p5 }
  0x24   : > { %626 = shalt.err (!%p623_p1)
}
  0x25   : > { %s627_s20 = scalar_lea.vmem %s862_s5, 768  ;;  %s760_s26 = smov [#allocation2]  }
  0x26   : > { %p628_p2 = scmp.ne.s32.totalorder %s862_s5, %s627_s20  ;;  %s632_s29 = sshll.u32 %s760_s26, 4  ;;  %s633_s29 = int_to_ptr.vmem [resolvable:$false] %s632_s29 }
  0x27   : > { %s634_s30 = scalar_lea.vmem %s633_s29, 1536  ;;  %p635_p9 = scmp.lt.s32.totalorder %s862_s5, %s633_s29 }
  0x28   : > { %p630_p4 = pnand %p628_p2, %p614_p3  ;;  %p636_p6 = scmp.lt.s32.totalorder %s634_s30, %s627_s20 }
  0x2a   : > { %p631_p11 = pneg %p630_p4  ;;  %p637_p7 = por %p636_p6, %p635_p9 }
  0x2c   : > { %p638_p10 = pnand %p637_p7, %p631_p11 }
  0x2e   : > { %641 = shalt.err (!%p638_p10)
}
  0x2f   : > { %s761_s4 = smov 128   ;;  %s762_s7 = smov 8  }
  0x30   : > { %552 = dma.hbm_to_vmem [thread:$0]  (!%p851_p0), %s860_s3, 768, %s862_s5, %s157_s6, %s761_s4, %s761_s4, %s762_s7  }
  0x31   : > { %p207_p12 = scmp.lt.s32.totalorder %s758_s14, 3  ;;  %s511_s8 = sshll.u32 %s845_s25, 3 }
  0x32   : > { %s900_s18 = scalar_lea.hbm %s1020_s1, %s536_s27  ;;  %p1029_p9 = scmp.ge.s32.totalorder %s758_s14, 1 }
  0x33   : > { %s186_s20 = scalar_lea.vmem [#allocation5], %s511_s8  ;;  %s183_s3 = scalar_lea.sflag [#allocation6], %s845_s25 }
  0x34   : > { %p904_p11 = pnand %p1029_p9, %p207_p12  ;;  %s202_s26 = sshll.u32 %s186_s20, 4  ;;  %s203_s26 = int_to_ptr.vmem [resolvable:$true] %s202_s26 }
  0x35   : > { %s642_s5 = scalar_lea.hbm %s900_s18, 128  ;;  %s647_s29 = scalar_lea.hbm %s1020_s1, 1536 }
  0x36   : > { %s1030_s19 = scalar_select %p904_p11, 1, 0 }
  0x37   : > { %p643_p1 = scmp.ne.s32.totalorder %s900_s18, %s642_s5  ;;  %p648_p2 = scmp.lt.u32.totalorder %s900_s18, %s1020_s1 }
  0x38   : > { %p649_p4 = scmp.lt.u32.totalorder %s647_s29, %s642_s5  ;;  %p651_p7 = scmp.lt.u32.totalorder %s642_s5, %s900_s18 }
  0x39   : > { %p645_p5 = pnand %p643_p1, %p614_p3 }
  0x3a   : > { %p650_p6 = por %p649_p4, %p648_p2 }
  0x3b   : > { %p646_p13 = pneg %p645_p5 }
  0x3c   : > { %p652_p10 = por %p651_p7, %p650_p6 }
  0x3e   : > { %p653_p12 = pnand %p652_p10, %p646_p13 }
  0x40   : > { %656 = shalt.err (!%p653_p12)
}
  0x41   : > { %s657_s25 = scalar_lea.vmem %s203_s26, 128  ;;  %s763_s7 = smov [#allocation5]  }
  0x42   : > { %p658_p9 = scmp.ne.s32.totalorder %s203_s26, %s657_s25  ;;  %s662_s8 = sshll.u32 %s763_s7, 4  ;;  %s663_s8 = int_to_ptr.vmem [resolvable:$false] %s662_s8 }
  0x43   : > { %s664_s15 = scalar_lea.vmem %s663_s8, 256  ;;  %p665_p8 = scmp.lt.s32.totalorder %s203_s26, %s663_s8 }
  0x44   : > { %p660_p1 = pnand %p658_p9, %p614_p3  ;;  %p666_p11 = scmp.lt.s32.totalorder %s664_s15, %s657_s25 }
  0x46   : > { %p661_p5 = pneg %p660_p1  ;;  %p667_p2 = por %p666_p11, %p665_p8 }
  0x48   : > { %p668_p4 = pnand %p667_p2, %p661_p5 }
  0x4a   : > { %671 = shalt.err (!%p668_p4)
}
  0x4b   : > { %555 = dma.hbm_to_vmem [thread:$0]  (!%p851_p0), %s900_s18, 128, %s203_s26, %s183_s3  }
  0x4c   : > { %p1031_p13 = scmp.ne.s32.totalorder %s1030_s19, 0 }
  0x4d   : > { %s931_s16 = sand.u32 (!%p1031_p13), 1, %s742_s10   ;;  %p1032_p8 = scmp.ne.s32.totalorder (!%p1031_p13), %s1025_s21, 0 }
  0x4e   : > { %211 = sbr.rel (%p1031_p13) target bundleno = 337 (0x151), region = 28  ;;  %s214_s5 = scalar_lea.sflag (!%p1031_p13), [#allocation3], %s931_s16 }
  0x4f   : > { %s538_s20 = smul.u32 (!%p1031_p13), 48, %s931_s16 }
  0x51   : > { %s935_s27 = scalar_lea.vmem (!%p1031_p13), [#allocation2], %s538_s20 }
  0x55   : > { %725 = dma.done.wait (%p1032_p8), %s214_s5, 768  }
  0x56   : > { %727 = vsyncadd (%p1032_p8), %s214_s5, 4294966528  ;;  %s514_s28 = sshll.u32 %s931_s16, 3  ;;  %s223_s18 = scalar_lea.sflag [#allocation6], %s931_s16 }
  0x57   : > { %s226_s19 = scalar_lea.vmem [#allocation5], %s514_s28 }
  0x58   : > { %729 = dma.done.wait (%p1032_p8), %s223_s18, 128  }
  0x59   : > { %731 = vsyncadd (%p1032_p8), %s223_s18, 4294967168  ;;  %v259_v0 = vld [vmem:[%s935_s27] sm:$0xff]  ;;  %v516_v2 = vld [vmem:[%s935_s27 + $0x8] sm:$0xff]  ;;  %vm338_vm0 = vcmask 1043456   ;;  %vm357_vm1 = vcmask 1042432   ;;  %s515_s21 = sshll.u32 %s931_s16, 1 }
  0x5a   : > { %v260_v1 = vld [vmem:[%s226_s19] sm:$0xff]  ;;  %v272_v4 = vsub.f32 %v516_v2, %v259_v0  ;;  %v519_v5 = vld [vmem:[%s935_s27 + $0x10] sm:$0xff]  ;;  %v528_v11 = vld [vmem:[%s935_s27 + $0x28] sm:$0xff]  ;;  %s251_s3 = scalar_lea.vmem [#allocation7], %s515_s21  ;;  %s532_s29 = sshll.u32 %s750_s12, 5 }
  0x5b   : > { %v261_v3 = vsub.f32 %v259_v0, %v260_v1  ;;  %v522_v6 = vld [vmem:[%s935_s27 + $0x18] sm:$0xff]  ;;  %v525_v7 = vld [vmem:[%s935_s27 + $0x20] sm:$0xff]  ;;  %v285_v8 = vsub.f32 %v519_v5, %v516_v2  ;;  %v517_v24 = vld [vmem:[%s935_s27 + $0x8] sm:$0xee]  ;;  %s390_s6 = sshll.u32 %s251_s3, 4  ;;  %s972_s7 = scalar_lea.hbm %s1021_s2, %s532_s29  ;;  %s967_s6 = int_to_ptr.vmem [resolvable:$true] %s390_s6 }
  0x5c   : > { %v298_v9 = vsub.f32 %v522_v6, %v519_v5  ;;  %v311_v10 = vsub.f32 %v525_v7, %v522_v6  ;;  %v263_v12 = vld [vmem:[%s935_s27] sm:$0xee]  ;;  %v273_v15 = vand.u32 2147483647, %v272_v4  ;;  %v324_v16 = vsub.f32 %v528_v11, %v525_v7  ;;  %v518_v25 = vld [vmem:[%s935_s27 + $0x8] sm:$0x77] }
  0x5d   : > { %v264_v13 = vld [vmem:[%s935_s27] sm:$0x77]  ;;  %v262_v14 = vand.u32 2147483647, %v261_v3  ;;  %v286_v18 = vand.u32 2147483647, %v285_v8 }
  0x5e   : > { %v266_v17 = vrot.slane %v264_v13, 7  ;;  %v299_v19 = vand.u32 2147483647, %v298_v9  ;;  %v312_v20 = vand.u32 2147483647, %v311_v10  ;;  %v277_v26 = vrot.slane %v518_v25, 7 }
  0x5f   : > { %v281_v21 = vadd.f32 %v273_v15, %v262_v14  ;;  %v325_v22 = vand.u32 2147483647, %v324_v16  ;;  %v520_v27 = vld [vmem:[%s935_s27 + $0x10] sm:$0xee]  ;;  %v523_v32 = vld [vmem:[%s935_s27 + $0x18] sm:$0xee] }
  0x60   : > { %v268_v23 = vsub.f32 %v263_v12, %v266_v17  ;;  %v521_v28 = vld [vmem:[%s935_s27 + $0x10] sm:$0x77]  ;;  %v279_v33 = vsub.f32 %v517_v24, %v277_v26  ;;  %v524_v34 = vld [vmem:[%s935_s27 + $0x18] sm:$0x77]  ;;  %v526_v35 = vld [vmem:[%s935_s27 + $0x20] sm:$0xee] }
  0x61   : > { %v294_v29 = vadd.f32 %v286_v18, %v281_v21  ;;  %v290_v31 = vrot.slane %v521_v28, 7  ;;  %v527_v36 = vld [vmem:[%s935_s27 + $0x20] sm:$0x77]  ;;  %v303_v39 = vrot.slane %v524_v34, 7  ;;  %v529_v41 = vld [vmem:[%s935_s27 + $0x28] sm:$0xee] }
  0x62   : > { %v269_v30 = vand.u32 2147483647, %v268_v23  ;;  %v316_v40 = vrot.slane %v527_v36, 7  ;;  %v530_v42 = vld [vmem:[%s935_s27 + $0x28] sm:$0x77]  ;;  %s375_s8 = scalar_lea.sflag [#allocation4], %s931_s16 }
  0x63   : > { %v307_v37 = vadd.f32 %v299_v19, %v294_v29  ;;  %v292_v38 = vsub.f32 %v520_v27, %v290_v31  ;;  %v280_v43 = vand.u32 2147483647, %v279_v33  ;;  %v329_v44 = vrot.slane %v530_v42, 7  ;;  %s672_s15 = scalar_lea.vmem %s967_s6, 32  ;;  %p1033_p3 = scmp.ne.s32.totalorder %s1026_s22, 0 }
  0x64   : > { %v305_v47 = vsub.f32 %v523_v32, %v303_v39  ;;  %v318_v48 = vsub.f32 %v526_v35, %v316_v40  ;;  %p673_p0 = scmp.ne.s32.totalorder %s967_s6, %s672_s15  ;;  %s764_s12 = smov [#allocation7]  }
  0x65   : > { %v320_v45 = vadd.f32 %v312_v20, %v307_v37  ;;  %v293_v46 = vand.u32 2147483647, %v292_v38  ;;  %v282_v49 = vadd.f32 %v280_v43, %v269_v30  ;;  %v331_v50 = vsub.f32 %v529_v41, %v329_v44  ;;  %s676_s20 = sshll.u32 %s764_s12, 4  ;;  %s677_s20 = int_to_ptr.vmem [resolvable:$false] %s676_s20 }
  0x66   : > { %v306_v52 = vand.u32 2147483647, %v305_v47  ;;  %v319_v54 = vand.u32 2147483647, %v318_v48  ;;  %p674_p11 = pnand %p673_p0, %p1033_p3  ;;  %s678_s5 = scalar_lea.vmem %s677_s20, 64 }
  0x67   : > { %v333_v51 = vadd.f32 %v325_v22, %v320_v45  ;;  %v295_v53 = vadd.f32 %v293_v46, %v282_v49  ;;  %v332_v58 = vand.u32 2147483647, %v331_v50  ;;  %p679_p7 = scmp.lt.s32.totalorder %s967_s6, %s677_s20  ;;  %p680_p10 = scmp.lt.s32.totalorder %s678_s5, %s672_s15 }
  0x68   : > { %p675_p6 = pneg %p674_p11 }
  0x69   : > { %v336_v55 = vcombine.high %v333_v51, %v333_v51  ;;  %v339_v56 = vsel %vm338_vm0, %v333_v51, 0.0  ;;  %v308_v57 = vadd.f32 %v306_v52, %v295_v53  ;;  %p681_p12 = por %p680_p10, %p679_p7 }
  0x6b   : > { %v340_v59 = vsel %vm338_vm0, %v336_v55, 0.0  ;;  %v321_v61 = vadd.f32 %v319_v54, %v308_v57  ;;  %p682_p9 = pnand %p681_p12, %p675_p6 }
  0x6c   : > { %v341_v60 = vadd.f32 %v340_v59, %v339_v56 }
  0x6d   : > { %v334_v62 = vadd.f32 %v332_v58, %v321_v61 }
  0x6e   : > { %342 = vadd.xlane.f32.xlu0 %v341_v60 }
  0x6f   : > { %v352_v63 = vcombine.high %v334_v62, %v334_v62  ;;  %v353_v0 = vrot.slane %v334_v62, 1 }
  0x71   : > { %v354_v1 = vrot.slane %v352_v63, 1  ;;  %v358_v2 = vsel %vm357_vm1, %v353_v0, 0.0 }
  0x73   : > { %v359_v3 = vsel %vm357_vm1, %v354_v1, 0.0 }
  0x74   : > { %v360_v4 = vadd.f32 %v359_v3, %v358_v2 }
  0x76   : > { %361 = vadd.xlane.f32.xlu0 %v360_v4 }
  0xfb   : > { %v343_v5 = vpop.xlane.xlu0 %342 }
  0xfc   : > { %v344_v6 = vrot.slane %v343_v5, 4 }
  0xfe   : > { %v345_v7 = vadd.f32 %v344_v6, %v343_v5 }
 0x100   : > { %v346_v8 = vrot.slane %v345_v7, 2 }
 0x102   : > { %v347_v9 = vadd.f32 %v346_v8, %v345_v7 }
 0x103   : > { %v362_v10 = vpop.xlane.xlu0 %361 }
 0x104   : > { %v348_v11 = vrot.slane %v347_v9, 1  ;;  %v363_v12 = vrot.slane %v362_v10, 4 }
 0x106   : > { %v349_v13 = vadd.f32 %v348_v11, %v347_v9  ;;  %v364_v14 = vadd.f32 %v363_v12, %v362_v10 }
 0x108   : > { %539 = vpush %v349_v13  ;;  %v365_v15 = vrot.slane %v364_v14, 2 }
 0x10a   : > { %v366_v16 = vadd.f32 %v365_v15, %v364_v14 }
 0x10c   : > { %v367_v17 = vrot.slane %v366_v16, 1 }
 0x10e   : > { %v368_v18 = vadd.f32 %v367_v17, %v366_v16 }
 0x110   : > { %541 = vpush %v368_v18 }
 0x139   : > { %s540_s26 = spop %539 }
 0x13a   : > { %v370_v19 = vstv %s540_s26 }
 0x13b   : > { %371 = vst [vmem:[%s251_s3] sm:$0x1] %v370_v19 }
 0x141   : > { %s542_s30 = spop %541 }
 0x142   : > { %v372_v20 = vstv %s542_s30 }
 0x143   : > { %373 = vst [vmem:[%s251_s3 + $0x1] sm:$0x1] %v372_v20 }
 0x144   : > { %685 = shalt.err (!%p682_p9)
}
 0x145   : > { %s686_s16 = scalar_lea.hbm %s972_s7, 32  ;;  %s690_s18 = scalar_lea.hbm %s1021_s2, 64 }
 0x146   : > { %p687_p1 = scmp.ne.s32.totalorder %s972_s7, %s686_s16  ;;  %p691_p4 = scmp.lt.u32.totalorder %s972_s7, %s1021_s2 }
 0x147   : > { %p692_p13 = scmp.lt.u32.totalorder %s690_s18, %s686_s16  ;;  %p694_p0 = scmp.lt.u32.totalorder %s686_s16, %s972_s7 }
 0x148   : > { %p688_p5 = pnand %p687_p1, %p1033_p3 }
 0x149   : > { %p693_p8 = por %p692_p13, %p691_p4 }
 0x14a   : > { %p689_p2 = pneg %p688_p5 }
 0x14b   : > { %p695_p11 = por %p694_p0, %p693_p8 }
 0x14d   : > { %p696_p6 = pnand %p695_p11, %p689_p2 }
 0x14f   : > { %699 = shalt.err (!%p696_p6)
}
 0x150   : > { %547 = dma.vmem_to_hbm [thread:$0]  (%p1033_p3), %s967_s6, 32, %s972_s7, %s375_s8  }
 0x151 PF: > { %s402_s26 = sand.u32 1, %s738_s9   ;;  %p1034_p7 = scmp.ne.s32.totalorder %s1027_s24, 0 }
 0x152   : > { %p1035_p10 = scmp.ge.s32.totalorder %s758_s14, 2  ;;  %s403_s3 = scalar_lea.sflag [#allocation4], %s402_s26 }
 0x154   : > { %p557_p12 = pnand %p1035_p10, %p1034_p7 }
 0x156   : > { %733 = dma.done.wait (!%p557_p12), %s403_s3, 32  }
 0x157   : > { %735 = vsyncadd (!%p557_p12), %s403_s3, 4294967264  ;;  %s21_s14 = sadd.s32 1, %s758_s14   ;;  %s1036_s9 = smov %s742_s10 }
 0x158   : > { %p18_p9 = scmp.ge.s32.totalorder %s21_s14, 4   ;;  %s1037_s10 = smov %s746_s11 }
 0x159   : > { %s1038_s11 = smov %s836_s23  ;;  %s1039_s12 = smov %s754_s13 }
 0x15a   : > { %s1040_s13 = smov %s1042_s17  ;;  %20 = sbr.rel (!%p18_p9) target bundleno = 8 (0x8), region = 91 }
 0x161   :  { %408 = vsyncpa [#allocation3], 1 }
 0x162   :  { %410 = vsyncpa [#allocation3 + $0x1], 1 }
 0x163   :  { %411 = vsyncpa [#allocation6], 1 }
 0x164   :  { %413 = vsyncpa [#allocation6 + $0x1], 1 }
 0x165   :  { %414 = vsyncpa [#allocation4], 1 }
 0x166   :  { %416 = vsyncpa [#allocation4 + $0x1], 1 }

</bundles_post_ra>
